<compile_context>
chip_gen: v7x
topology: tpu7x:2x2x1
jax: 0.10.0
libtpu: 0.0.40
codegen_flags: <defaults>
</compile_context>

<pallas_src>
import jax
import jax.numpy as jnp
from jax.experimental import pallas as pl
from jax.experimental.pallas import tpu as pltpu


def _round_up(x, m):
    return (x + m - 1) // m * m


def _vmem_capacity_bytes():
    """Per-core VMEM capacity; conservative (v7x) fallback if query fails."""
    try:
        info = pltpu.get_tpu_info()
        cap = getattr(info, "vmem_capacity_bytes", None)
        if cap:
            return int(cap)
    except Exception:
        pass
    return 64 << 20


def _resident(shape):
    """VMEM-resident operand: constant block index, single-buffered."""
    idx = lambda i, j: (0, 0)
    try:
        return pl.BlockSpec(shape, idx, pipeline_mode=pl.Buffered(1))
    except (AttributeError, TypeError):   # older jax without pipeline_mode
        return pl.BlockSpec(shape, idx)


# ----------------------------- Pallas kernel --------------------------------
def _make_kernel(n_hidden, fused_gather):
    """Builds the fused forward kernel.

    Ref order (fused_gather=True):
        tok (tn,1) i32, emb (Ve,E) bf16, [w (E,E) bf16, b (1,E) f32]*n_hidden,
        w_last (E,tv) bf16, b_last (1,tv) f32, out (tn,tv) f32
    Ref order (fused_gather=False): x (tn,E) bf16 replaces (tok, emb).
    """
    def kernel(*refs):
        if fused_gather:
            tok_ref, emb_ref = refs[0], refs[1]
            rest = refs[2:]
            tok = tok_ref[...]                                  # (tn, 1) int32
            ids = jax.lax.broadcasted_iota(
                jnp.int32, (tok.shape[0], emb_ref.shape[0]), 1)
            onehot = (tok == ids).astype(jnp.bfloat16)          # (tn, Ve)
            x = jnp.dot(onehot, emb_ref[...],
                        preferred_element_type=jnp.float32)     # (tn, E) f32
        else:
            x_ref = refs[0]
            rest = refs[1:]
            x = x_ref[...]                                      # (tn, E) bf16

        out_ref = rest[-1]
        rest = rest[:-1]

        # Hidden ternary layers (bf16 weights are exact for {-1,0,1}; f32 acc).
        for l in range(n_hidden):
            w_ref, b_ref = rest[2 * l], rest[2 * l + 1]
            x = (jnp.dot(x.astype(jnp.bfloat16), w_ref[...],
                         preferred_element_type=jnp.float32) + b_ref[...])

        # Final (possibly pre-composed) projection to the vocab tile.
        w_ref, b_ref = rest[2 * n_hidden], rest[2 * n_hidden + 1]
        out_ref[...] = (jnp.dot(x.astype(jnp.bfloat16), w_ref[...],
                                preferred_element_type=jnp.float32)
                        + b_ref[...])
    return kernel


# ------------------------------ wrapper --------------------------------------
def transformer_forward(tokens, params, *, tile_n=1024, tile_v=2048,
                        precompose=True):
    emb = params["embedding"]          # (V, E)
    V, E = emb.shape
    B, S = tokens.shape
    N = B * S

    # ---- generation-aware VMEM budget ----------------------------------------
    vmem_cap = _vmem_capacity_bytes()                 # 128 MiB v5e/v6e, 64 MiB v7x
    budget = max(vmem_cap - (24 << 20), 32 << 20)

    Ve = _round_up(V, 128)                            # padded embedding rows
    Vp0 = _round_up(V, 128)                           # minimal padded vocab cols
    emb_bytes = Ve * E * 2                            # bf16 resident table
    fused_gather = emb_bytes <= budget // 8
    # TODO(synk): for very large embedding tables switch to a scalar-prefetch +
    # pl.Element row-gather instead of the XLA-side gather fallback below.

    n_hidden = 0 if precompose else 3
    resident_bytes = ((emb_bytes if fused_gather else 0)
                      + n_hidden * (E * E * 2 + E * 4))

    # ---- tile-size derivation (dtype-correct footprint) -----------------------
    tn = max(8, min(_round_up(tile_n, 8), _round_up(N, 8)))
    tv = max(128, min(_round_up(tile_v, 128), Vp0))

    def footprint(tn_, tv_):
        in_b = tn_ * 4 if fused_gather else tn_ * E * 2
        stream = 2 * (in_b + E * tv_ * 2 + tv_ * 4 + tn_ * tv_ * 4)
        return resident_bytes + stream

    while footprint(tn, tv) > budget and (tn > 8 or tv > 128):
        if tv > 128 and (tv // 128) >= (tn // 8):
            tv = max(128, (tv // 2) // 128 * 128)
        elif tn > 8:
            tn = max(8, _round_up(tn // 2, 8))
        else:
            tv = max(128, (tv // 2) // 128 * 128)

    # v7x megacore: make sure there are >= 2 token tiles so neither TC idles.
    if _round_up(N, tn) // tn < 2 and N > 8:
        tn = _round_up((N + 1) // 2, 8)

    Np = _round_up(N, tn)
    Vp = _round_up(V, tv)
    grid = (Np // tn, Vp // tv)

    vmem_limit = int(min(max(footprint(tn, tv) + (8 << 20), 32 << 20),
                         vmem_cap - (8 << 20)))

    # ---- one-time (per call) XLA-side preprocessing ---------------------------
    def quantize(w):
        gamma = jnp.mean(jnp.abs(w)) + 1e-5
        return jnp.clip(jnp.round(w / gamma), -1.0, 1.0)      # f32 ternary

    w1q = quantize(params["w1"])
    w2q = quantize(params["w2"])
    w3q = quantize(params["w3"])

    wo_t = jnp.zeros((E, Vp), jnp.float32).at[:, :V].set(params["wo"].T)
    bo_p = jnp.zeros((1, Vp), jnp.float32).at[:, :V].set(params["bo"])

    if precompose:
        # Affine layers compose exactly (done once in f32): x @ Wc + bc.
        Wc = ((w1q @ w2q) @ w3q) @ wo_t
        bc = (((params["b1"] @ w2q + params["b2"]) @ w3q + params["b3"]) @ wo_t
              + bo_p)
        layer_ops = []
        w_last, b_last = Wc.astype(jnp.bfloat16), bc
    else:
        layer_ops = [(w1q.astype(jnp.bfloat16), params["b1"]),
                     (w2q.astype(jnp.bfloat16), params["b2"]),
                     (w3q.astype(jnp.bfloat16), params["b3"])]
        w_last, b_last = wo_t.astype(jnp.bfloat16), bo_p

    inputs, in_specs = [], []
    if fused_gather:
        tok = (jnp.zeros((Np, 1), jnp.int32)
               .at[:N, 0].set(tokens.reshape(-1).astype(jnp.int32)))
        emb_p = (jnp.zeros((Ve, E), jnp.bfloat16)
                 .at[:V, :].set(emb.astype(jnp.bfloat16)))
        inputs += [tok, emb_p]
        in_specs += [pl.BlockSpec((tn, 1), lambda i, j: (i, 0)),
                     _resident((Ve, E))]
    else:
        x = jnp.take(emb, tokens.reshape(-1), axis=0).astype(jnp.bfloat16)
        x = jnp.pad(x, ((0, Np - N), (0, 0)))
        inputs.append(x)
        in_specs.append(pl.BlockSpec((tn, E), lambda i, j: (i, 0)))

    for w, b in layer_ops:
        inputs += [w, b]
        in_specs += [_resident((E, E)), _resident((1, E))]

    inputs += [w_last, b_last]
    in_specs += [pl.BlockSpec((E, tv), lambda i, j: (0, j)),
                 pl.BlockSpec((1, tv), lambda i, j: (0, j))]

    logits_p = pl.pallas_call(
        _make_kernel(n_hidden, fused_gather),
        out_shape=jax.ShapeDtypeStruct((Np, Vp), jnp.float32),
        grid=grid,
        in_specs=in_specs,
        out_specs=pl.BlockSpec((tn, tv), lambda i, j: (i, j)),
        compiler_params=pltpu.CompilerParams(
            dimension_semantics=("parallel", "parallel"),
            vmem_limit_bytes=vmem_limit),
    )(*inputs)

    return logits_p[:N, :V].reshape(B, S, V)


# --------------------------- pure-JAX f32 reference ---------------------------
def reference_forward(tokens, params):
    emb = params["embedding"]
    x = jnp.take(emb, tokens.reshape(-1), axis=0)
    for wk, bk in (("w1", "b1"), ("w2", "b2"), ("w3", "b3")):
        w = params[wk]
        gamma = jnp.mean(jnp.abs(w)) + 1e-5
        wq = jnp.clip(jnp.round(w / gamma), -1.0, 1.0)
        x = x @ wq + params[bk]
    x = x @ params["wo"].T + params["bo"]
    return x.reshape(tokens.shape + (params["wo"].shape[0],))


# --------------------------- deterministic init -------------------------------
def init_params(key, vocab_size, embed_size):
    ks = jax.random.split(key, 6)
    bound = 1.0 / embed_size ** 0.5
    return {
        # nn.Embedding default init: N(0, 1)
        "embedding": jax.random.normal(ks[0], (vocab_size, embed_size),
                                       jnp.float32),
        # QuantizedLinear: weight ~ randn, bias = zeros
        "w1": jax.random.normal(ks[1], (embed_size, embed_size), jnp.float32),
        "b1": jnp.zeros((1, embed_size), jnp.float32),
        "w2": jax.random.normal(ks[2], (embed_size, embed_size), jnp.float32),
        "b2": jnp.zeros((1, embed_size), jnp.float32),
        "w3": jax.random.normal(ks[3], (embed_size, embed_size), jnp.float32),
        "b3": jnp.zeros((1, embed_size), jnp.float32),
        # fc_out: nn.Linear(embed_size, vocab_size)
        "wo": jax.random.uniform(ks[4], (vocab_size, embed_size), jnp.float32,
                                 -bound, bound),
        "bo": jax.random.uniform(ks[5], (1, vocab_size), jnp.float32,
                                 -bound, bound),
    }


if __name__ == "__main__":
    VOCAB = 65        # tinyshakespeare character vocabulary
    EMBED = 32        # small embed_size for the synthetic test
    BATCH, SEQ = 2, 8

    key = jax.random.PRNGKey(0)
    k_tok, k_par = jax.random.split(key)

    tokens = jax.random.randint(k_tok, (BATCH, SEQ), 0, VOCAB, dtype=jnp.int32)
    params = init_params(k_par, VOCAB, EMBED)

    ref = reference_forward(tokens, params)

    out = transformer_forward(tokens, params)                    # composed path
    out_general = transformer_forward(tokens, params, precompose=False)
    jax.block_until_ready((out, out_general))

    ref_norm = jnp.linalg.norm(ref) + 1e-6
    for o in (out, out_general):
        assert o.shape == (BATCH, SEQ, VOCAB), o.shape
        assert o.dtype == jnp.float32
        assert bool(jnp.all(jnp.isfinite(o)))
        rel = float(jnp.linalg.norm(o - ref) / ref_norm)
        assert rel < 5e-2, rel
    print("KERNEL_OK")
</pallas_src>

<mosaic_0001>
module attributes {stable_mosaic.version = 11 : i64} {
  func.func @kernel(%arg0: i32, %arg1: i32, %arg2: memref<8x1xi32, #tpu.memory_space<vmem>>, %arg3: memref<128x32xbf16, #tpu.memory_space<vmem>>, %arg4: memref<32x128xbf16, #tpu.memory_space<vmem>>, %arg5: memref<1x128xf32, #tpu.memory_space<vmem>>, %arg6: memref<8x128xf32, #tpu.memory_space<vmem>>) attributes {dimension_semantics = [#tpu.dimension_semantics<parallel>, #tpu.dimension_semantics<parallel>], iteration_bounds = array<i64: 2, 1>, scalar_prefetch = 0 : i64, scratch_operands = 0 : i64, tpu.core_type = #tpu.core_type<tc>, window_params = [{transform_indices = @transform_0, window_bounds = array<i64: 8, 1>}, {pipeline_mode = #tpu.pipeline_mode<synchronous>, transform_indices = @transform_1, window_bounds = array<i64: 128, 32>}, {transform_indices = @transform_2, window_bounds = array<i64: 32, 128>}, {transform_indices = @transform_3, window_bounds = array<i64: 1, 128>}, {transform_indices = @transform_4, window_bounds = array<i64: 8, 128>}]} {
    %c0 = arith.constant 0 : index
    %c0_0 = arith.constant 0 : index
    %0 = vector.load %arg2[%c0, %c0_0] : memref<8x1xi32, #tpu.memory_space<vmem>>, vector<8x1xi32>
    %1 = tpu.iota {dimensions = array<i32: 1>} : vector<8x128xi32>
    %2 = vector.broadcast %0 : vector<8x1xi32> to vector<8x128xi32>
    %3 = arith.cmpi eq, %2, %1 : vector<8x128xi32>
    %4 = arith.extui %3 : vector<8x128xi1> to vector<8x128xi32>
    %5 = arith.sitofp %4 : vector<8x128xi32> to vector<8x128xf32>
    %6 = arith.truncf %5 : vector<8x128xf32> to vector<8x128xbf16>
    %c0_1 = arith.constant 0 : index
    %c0_2 = arith.constant 0 : index
    %7 = vector.load %arg3[%c0_1, %c0_2] : memref<128x32xbf16, #tpu.memory_space<vmem>>, vector<128x32xbf16>
    %cst = arith.constant dense<0.000000e+00> : vector<8x32xf32>
    %8 = tpu.matmul %6, %7, %cst {dimension_numbers = #tpu.dot_dimension_numbers<[1], [0], [0], [1], [0, 0, 1, 1], [], []>} : vector<8x128xbf16>, vector<128x32xbf16>, vector<8x32xf32> -> vector<8x32xf32>
    %9 = arith.truncf %8 : vector<8x32xf32> to vector<8x32xbf16>
    %c0_3 = arith.constant 0 : index
    %c0_4 = arith.constant 0 : index
    %10 = vector.load %arg4[%c0_3, %c0_4] : memref<32x128xbf16, #tpu.memory_space<vmem>>, vector<32x128xbf16>
    %cst_5 = arith.constant dense<0.000000e+00> : vector<8x128xf32>
    %11 = tpu.matmul %9, %10, %cst_5 {dimension_numbers = #tpu.dot_dimension_numbers<[1], [0], [0], [1], [0, 0, 1, 1], [], []>} : vector<8x32xbf16>, vector<32x128xbf16>, vector<8x128xf32> -> vector<8x128xf32>
    %c0_6 = arith.constant 0 : index
    %c0_7 = arith.constant 0 : index
    %12 = vector.load %arg5[%c0_6, %c0_7] : memref<1x128xf32, #tpu.memory_space<vmem>>, vector<1x128xf32>
    %13 = vector.broadcast %12 : vector<1x128xf32> to vector<8x128xf32>
    %14 = arith.addf %11, %13 : vector<8x128xf32>
    %c0_8 = arith.constant 0 : index
    %c0_9 = arith.constant 0 : index
    %15 = vector.load %arg6[%c0_8, %c0_9] : memref<8x128xf32, #tpu.memory_space<vmem>>, vector<8x128xf32>
    tpu.vector_store %arg6[%c0_8, %c0_9], %14 {strides = array<i32>} : memref<8x128xf32, #tpu.memory_space<vmem>>, vector<8x128xf32>,
    return
  }
  func.func @transform_0(%arg0: i32, %arg1: i32) -> (i32, i32) {
    %c0_i32 = arith.constant 0 : i32
    %c0_i32_0 = arith.constant 0 : i32
    return %arg0, %c0_i32 : i32, i32
  }
  func.func @transform_1(%arg0: i32, %arg1: i32) -> (i32, i32) {
    %c0_i32 = arith.constant 0 : i32
    %c0_i32_0 = arith.constant 0 : i32
    %c0_i32_1 = arith.constant 0 : i32
    return %c0_i32, %c0_i32_0 : i32, i32
  }
  func.func @transform_2(%arg0: i32, %arg1: i32) -> (i32, i32) {
    %c0_i32 = arith.constant 0 : i32
    %c0_i32_0 = arith.constant 0 : i32
    return %c0_i32, %arg1 : i32, i32
  }
  func.func @transform_3(%arg0: i32, %arg1: i32) -> (i32, i32) {
    %c0_i32 = arith.constant 0 : i32
    %c0_i32_0 = arith.constant 0 : i32
    return %c0_i32, %arg1 : i32, i32
  }
  func.func @transform_4(%arg0: i32, %arg1: i32) -> (i32, i32) {
    %c0_i32 = arith.constant 0 : i32
    return %arg0, %arg1 : i32, i32
  }
}

</mosaic_0001>

<bundles_post_ra>
// kernel: tpu_custom_call.1
= control target key start
LH: loop header
LB: loop body
LE: loop exit
PB: predicated region body
PF: predicated region fallthrough
CT: control target
= control target key end

     0   :  { %9 = vsyncpa [#allocation3], 0  ;;  %s925_s0 = inlined_call_operand.vmem [shape: s32[16,1], index: 0, kind: input, shape index: {}]   ;;  %s926_s1 = inlined_call_operand.vmem [shape: bf16[128,32], index: 1, kind: input, shape index: {}]   ;;  %s927_s2 = inlined_call_operand.vmem [shape: bf16[32,128], index: 2, kind: input, shape index: {}]   ;;  %s928_s3 = inlined_call_operand.vmem [shape: f32[1,128], index: 3, kind: input, shape index: {}]   ;;  %s929_s4 = inlined_call_operand.hbm [shape: f32[16,128], index: 4, kind: output, shape index: {}]  }
   0x1   :  { %11 = vsyncpa [#allocation3 + $0x1], 0  ;;  %s780_s15 = smov 0   ;;  %s782_s16 = smov 0  }
   0x2   :  { %s784_s17 = smov 0   ;;  %s786_s18 = smov 0  }
   0x3   :  { %s788_s19 = smov 0   ;;  %s790_s20 = smov 0  }
   0x4 LB: > { %s532_s21 = sadd.s32 4294967295, %s748_s20   ;;  %s533_s22 = sadd.s32 4294967294, %s748_s20   ;;  %s748_s20 = sphi %s790_s20, %s17_s20   ;;  %s744_s19 = sphi %s788_s19, %s936_s19   ;;  %s740_s18 = sphi %s786_s18, %s935_s18   ;;  %s736_s17 = sphi %s784_s17, %s934_s17   ;;  %s732_s16 = sphi %s782_s16, %s933_s16   ;;  %s728_s15 = sphi %s780_s15, %s932_s15  }
   0x5   : > { %s29_s23 = sadd.s32 1, %s744_s19  ;;  %s137_s24 = sadd.s32 1, %s736_s17 }
   0x6   : > { %p31_p0 = scmp.ge.s32.totalorder %s29_s23, 2  ;;  %p147_p1 = scmp.ne.s32.totalorder %s736_s17, %s732_s16 }
   0x7   : > { %p148_p2 = scmp.eq.s32.totalorder %s532_s21, 1  ;;  %p153_p3 = scmp.ne.s32.totalorder %s732_s16, %s728_s15 }
   0x8   : > { %s938_s23 = smov (%p31_p0, %s29_s23), 0  ;;  %p154_p5 = scmp.eq.s32.totalorder %s533_s22, 1 }
   0x9   : > { %p820_p4 = por %p148_p2, %p147_p1  ;;  %s132_s26 = ssub.s32 %s744_s19, %s938_s23 }
   0xa   : > { %p538_p6 = scmp.ge.s32.totalorder %s748_s20, 1  ;;  %p135_p7 = scmp.eq.s32.totalorder %s132_s26, 0 }
   0xb   : > { %p827_p8 = por %p154_p5, %p153_p3  ;;  %p195_p9 = scmp.lt.s32.totalorder %s748_s20, 3 }
   0xc   : > { %s833_s28 = scalar_select %p135_p7, %s736_s17, %s137_s24  }
   0xd   : > { %p196_p10 = pnand %p538_p6, %p195_p9 }
   0xe   : > { %p227_p11 = scmp.lt.s32.totalorder (!%p196_p10), %s740_s18, 1  ;;  %v660_v0 = vld [vmem:[%s926_s1] sm:$0xff] (!%p196_p10)   ;;  %v750_v1 = vmov (!%p196_p10), 0   ;;  %v751_v2 = vmov (!%p196_p10), 0.0   ;;  %v661_v3 = vld [vmem:[%s926_s1 + $0x8] sm:$0xff] (!%p196_p10)   ;;  %v662_v5 = vld [vmem:[%s926_s1 + $0x10] sm:$0xff] (!%p196_p10)   ;;  %v240_v12 = vlaneseq (!%p196_p10) }
   0xf   : > { %199 = sbr.rel (%p196_p10) target bundleno = 599 (0x257), region = 36  ;;  %659 = vset.pattern.permute.xlu0 (!%p196_p10), %v750_v1  ;;  %572 = vmatprep.subr.bf16.mxu0 (!%p196_p10), %v751_v2  ;;  %vm752_vm0 = vmmov (!%p196_p10), 0   ;;  %v668_v6 = vld [vmem:[%s927_s2] sm:$0xff] (!%p196_p10)   ;;  %v663_v7 = vld [vmem:[%s926_s1 + $0x18] sm:$0xff] (!%p196_p10)   ;;  %v665_v9 = vld [vmem:[%s926_s1 + $0x28] sm:$0xff] (!%p196_p10)   ;;  %vm377_vm3 = vcmask (!%p196_p10), 261120  }
  0x10   : > { %573 = vmatpush3.bf16.msra.mxu0 (!%p196_p10), %v660_v0  ;;  %592 = vmatprep.subr.bf16.mxu1 (!%p196_p10), %v751_v2  ;;  %v664_v8 = vld [vmem:[%s926_s1 + $0x20] sm:$0xff] (!%p196_p10)   ;;  %v666_v10 = vld [vmem:[%s926_s1 + $0x30] sm:$0xff] (!%p196_p10)   ;;  %v667_v11 = vld [vmem:[%s926_s1 + $0x38] sm:$0xff] (!%p196_p10)   ;;  %v241_v13 = vand.u32 (!%p196_p10), 127, %v240_v12  ;;  %v753_v15 = vmov (!%p196_p10), 1.0|1.0  }
  0x11   : > { %574 = vmatprep.subr.bf16.mxu0 (!%p196_p10), %v751_v2  ;;  %588 = vmatprep.mubr.msk.bf16.mxu0 (!%p196_p10), %vm752_vm0, %v751_v2  ;;  %v669_v16 = vld [vmem:[%s927_s2 + $0x8] sm:$0xff] (!%p196_p10)   ;;  %s224_s12 = sand.u32 (!%p196_p10), 1, %s732_s16   ;;  %v552_v22 = vld [vmem:[%s928_s3] ss:$0 sm:$0xff] (!%p196_p10)  ;;  %s557_s22 = sshll.u32 (!%p196_p10), %s740_s18, 7 }
  0x12   : > { %596 = vmatprep.mubr.msk.bf16.mxu1 (!%p196_p10), %vm752_vm0, %v751_v2  ;;  %593 = vmatpush3.bf16.msra.mxu1 (!%p196_p10), %v668_v6  ;;  %s539_s13 = sshll.u32 (!%p196_p10), %s224_s12, 3  ;;  %s423_s6 = scalar_lea.sflag (!%p196_p10), [#allocation3], %s224_s12 }
  0x13   : > { %594 = vmatprep.subr.bf16.mxu1 (!%p196_p10), %v751_v2  ;;  %s226_s24 = scalar_lea.vmem (!%p196_p10), [#allocation2], %s539_s13  ;;  %s754_s7 = smov (!%p196_p10), [#allocation2]  }
  0x14   : > { %575 = vmatpush3.bf16.msra.mxu0 (!%p196_p10), %v661_v3  ;;  %s437_s26 = sshll.u32 (!%p196_p10), %s226_s24, 4  ;;  %s880_s26 = int_to_ptr.vmem [resolvable:$true] %s437_s26 }
  0x15   : > { %576 = vmatprep.subr.bf16.mxu0 (!%p196_p10), %v751_v2 }
  0x16   : > { %s228_s5 = scalar_select %p227_p11, %s740_s18, 1  ;;  %595 = vmatpush3.bf16.msra.mxu1 %v669_v16 }
  0x17   : > { %s670_s18 = scalar_lea.vmem %s880_s26, 128 }
  0x18   : > { %s540_s8 = sshll.u32 %s228_s5, 3  ;;  %577 = vmatpush3.bf16.msra.mxu0 %v662_v5  ;;  %s878_s5 = scalar_lea.hbm %s929_s4, %s557_s22 }
  0x19   : > { %s230_s11 = scalar_lea.vmem %s925_s0, %s540_s8  ;;  %578 = vmatprep.subr.bf16.mxu0 %v751_v2  ;;  %p671_p12 = scmp.ne.s32.totalorder %s880_s26, %s670_s18 }
  0x1a   : > { %v239_v4 = vld [vmem:[%s230_s11] sm:$0xff]  ;;  %s674_s8 = sshll.u32 %s754_s7, 4  ;;  %s675_s8 = int_to_ptr.vmem [resolvable:$false] %s674_s8 }
  0x1b   : > { %243 = vperm.xlu0 %659, %v239_v4   ;;  %p672_p13 = pnand %p671_p12, %p820_p4  ;;  %s676_s9 = scalar_lea.vmem %s675_s8, 256 }
  0x1c   : > { %579 = vmatpush3.bf16.msra.mxu0 %v663_v7  ;;  %p677_p1 = scmp.lt.s32.totalorder %s880_s26, %s675_s8  ;;  %p678_p2 = scmp.lt.s32.totalorder %s676_s9, %s670_s18 }
  0x1d   : > { %580 = vmatprep.subr.bf16.mxu0 %v751_v2  ;;  %p673_p0 = pneg %p672_p13 }
  0x1e   : > { %p679_p3 = por %p678_p2, %p677_p1 }
  0x20   : > { %581 = vmatpush3.bf16.msra.mxu0 %v664_v8  ;;  %p680_p5 = pnand %p679_p3, %p673_p0 }
  0x21   : > { %582 = vmatprep.subr.bf16.mxu0 %v751_v2 }
  0x24   : > { %583 = vmatpush3.bf16.msra.mxu0 %v665_v9 }
  0x25   : > { %584 = vmatprep.subr.bf16.mxu0 %v751_v2 }
  0x28   : > { %585 = vmatpush3.bf16.msra.mxu0 %v666_v10 }
  0x29   : > { %586 = vmatprep.subr.bf16.mxu0 %v751_v2 }
  0x2c   : > { %587 = vmatpush3.bf16.msra.mxu0 %v667_v11 }
  0x9a   : > { %v244_v14 = vpop.permute.xlu0 %243 }
  0x9b   : > { %vm245_vm1 = vcmp.eq.s32.totalorder %v244_v14, %v241_v13 }
  0x9c   : > { %vm550_vm2 = vmpackc.low %vm245_vm1, %vm245_vm1 }
  0x9d   : > { %589 = vmatmul.mubr.msk.bf16.vlgmr.msra.gmra.mrb[0].mxu0 %vm550_vm2, %v753_v15 }
 0x170   : > { %v347_v17 = vpop.f32.mrb[0].mxu0 }
 0x171   : > { %v353_v18 = vpack.c.bf16 %v347_v17, %v347_v17  ;;  %v590_v19 = vpop.f32.mrb[1].mxu0 }
 0x172   : > { %v350_v20 = vpop.f32.mrb[2].mxu0 }
 0x173   : > { %v591_v21 = vpop.f32.mrb[3].mxu0  ;;  %597 = vmatmul.mubr.msk.bf16.vlgmr.msra.gmra.mrb[0].mxu1 %vm377_vm3, %v353_v18 }
 0x246   : > { %v415_v23 = vpop.f32.mrb[0].mxu1 }
 0x247   : > { %v416_v24 = vadd.f32 %v552_v22, %v415_v23  ;;  %v598_v25 = vpop.f32.mrb[1].mxu1 }
 0x248   : > { %v418_v26 = vpop.f32.mrb[2].mxu1 }
 0x249   : > { %421 = vst [vmem:[%s226_s24] sm:$0xff] %v416_v24  ;;  %v599_v27 = vpop.f32.mrb[3].mxu1 }
 0x24a   : > { %683 = shalt.err (!%p680_p5)
}
 0x24b   : > { %s684_s10 = scalar_lea.hbm %s878_s5, 128  ;;  %s688_s13 = scalar_lea.hbm %s929_s4, 256 }
 0x24c   : > { %p685_p6 = scmp.ne.s32.totalorder %s878_s5, %s684_s10  ;;  %p689_p10 = scmp.lt.u32.totalorder %s878_s5, %s929_s4 }
 0x24d   : > { %p690_p11 = scmp.lt.u32.totalorder %s688_s13, %s684_s10  ;;  %p692_p13 = scmp.lt.u32.totalorder %s684_s10, %s878_s5 }
 0x24e   : > { %p686_p7 = pnand %p685_p6, %p820_p4 }
 0x24f   : > { %p691_p12 = por %p690_p11, %p689_p10 }
 0x250   : > { %p687_p9 = pneg %p686_p7 }
 0x251   : > { %p693_p0 = por %p692_p13, %p691_p12 }
 0x253   : > { %p694_p1 = pnand %p693_p0, %p687_p9 }
 0x255   : > { %697 = shalt.err (!%p694_p1)
}
 0x256   : > { %600 = dma.vmem_to_hbm [thread:$0]  (%p820_p4), %s880_s26, 128, %s878_s5, %s423_s6  }
 0x257 PF: > { %p606_p2 = scmp.ge.s32.totalorder %s748_s20, 2  ;;  %s449_s22 = sand.u32 1, %s728_s15  }
 0x258   : > { %s450_s24 = scalar_lea.sflag [#allocation3], %s449_s22 }
 0x259   : > { %p603_p3 = pnand %p606_p2, %p827_p8 }
 0x25b   : > { %723 = dma.done.wait (!%p603_p3), %s450_s24, 128  }
 0x25c   : > { %725 = vsyncadd (!%p603_p3), %s450_s24, 4294967168  ;;  %s17_s20 = sadd.s32 1, %s748_s20   ;;  %s932_s15 = smov %s732_s16 }
 0x25d   : > { %p14_p5 = scmp.ge.s32.totalorder %s17_s20, 4   ;;  %s933_s16 = smov %s736_s17 }
 0x25e   : > { %s934_s17 = smov %s833_s28  ;;  %s935_s18 = smov %s744_s19 }
 0x25f   : > { %s936_s19 = smov %s938_s23  ;;  %16 = sbr.rel (!%p14_p5) target bundleno = 4 (0x4), region = 77 }
 0x266   :  { %455 = vsyncpa [#allocation3], 1 }
 0x267   :  { %457 = vsyncpa [#allocation3 + $0x1], 1 }

</bundles_post_ra>
